<compile_context>
chip_gen: v5e
topology: v5e:2x2
jax: 0.10.0
libtpu: 0.0.40
codegen_flags: <defaults>
</compile_context>

<pallas_src>
import math
import functools

import jax
import jax.numpy as jnp
from jax.experimental import pallas as pl
from jax.experimental.pallas import tpu as pltpu


_LANES = 128
_MAX_TILE_ROWS = 2048  # 2048 x 128 f32 = 1 MiB per tile; ~6 MiB live w/ double buffering


def build_pe_table(d_model: int, max_len: int) -> jnp.ndarray:
    """Replicates the PyTorch buffer: pe[0, :, 0::2]=sin, pe[0, :, 1::2]=cos."""
    position = jnp.arange(max_len, dtype=jnp.float32)[:, None]          # [max_len, 1]
    div_term = jnp.exp(
        jnp.arange(0, d_model, 2, dtype=jnp.float32) * (-math.log(10000.0) / d_model)
    )                                                                    # [d_model//2]
    angles = position * div_term                                         # [max_len, d_model//2]
    pe = jnp.zeros((max_len, d_model), dtype=jnp.float32)
    pe = pe.at[:, 0::2].set(jnp.sin(angles))
    pe = pe.at[:, 1::2].set(jnp.cos(angles))
    return pe                                                            # [max_len, d_model]


def _pos_enc_kernel(seed_ref, x_ref, pe_ref, o_ref, *,
                    dropout_p, training, rows_per_batch):
    # x_ref / pe_ref / o_ref blocks are (TR, C); batch dim is squeezed.
    y = x_ref[...].astype(jnp.float32) + pe_ref[...].astype(jnp.float32)

    if training and dropout_p > 0.0:
        tr, c = x_ref.shape
        r_tile = pl.program_id(0)   # outer: row tile
        b = pl.program_id(1)        # inner: batch element
        # Global element offset (unique across batch, tile, row, lane).
        rows_i = jax.lax.broadcasted_iota(jnp.int32, (tr, c), 0)
        cols_i = jax.lax.broadcasted_iota(jnp.int32, (tr, c), 1)
        offs = ((b * rows_per_batch + r_tile * tr + rows_i) * c + cols_i)
        offs = offs.astype(jnp.uint32)
        # Counter-based hash PRNG (lowbias32-style finalizer): portable uint32
        # VPU ops only — no pltpu.prng_* (which has no interpret-mode lowering).
        h = offs ^ seed_ref[0].astype(jnp.uint32)
        h = (h ^ (h >> jnp.uint32(16))) * jnp.uint32(0x7FEB352D)
        h = (h ^ (h >> jnp.uint32(15))) * jnp.uint32(0x846CA68B)
        h = h ^ (h >> jnp.uint32(16))
        threshold = jnp.uint32(min(int(round(dropout_p * float(2 ** 32))), 2 ** 32 - 1))
        keep = h >= threshold
        scale = jnp.float32(1.0 / (1.0 - dropout_p))
        y = jnp.where(keep, y * scale, jnp.zeros_like(y))

    o_ref[...] = y.astype(o_ref.dtype)


def positional_encoding(x, pe_table, *, dropout_p=0.1, training=False, seed=0):
    """x: [B, S, D]; pe_table: [max_len, D]. Returns [B, S, D] = dropout(x + pe[:S])."""
    B, S, D = x.shape
    max_len, d_model = pe_table.shape
    assert S <= max_len and D == d_model
    pe = pe_table[:S, :]                                  # self.pe[:, :x.size(1)]

    # Lane-dense layout: flatten (S, D) -> (rows, 128) when D is narrow.
    if D < _LANES and (S * D) % _LANES == 0:
        rows, cols = (S * D) // _LANES, _LANES
        x2 = x.reshape(B, rows, cols)
        pe2 = pe.reshape(rows, cols)
    else:
        rows, cols = S, D
        x2 = x
        pe2 = pe

    # Row tiling sized for VMEM (v7x-safe): full rows if small, else 2048-row tiles.
    tr = rows if rows <= _MAX_TILE_ROWS else _MAX_TILE_ROWS
    n_row_tiles = pl.cdiv(rows, tr)
    grid = (n_row_tiles, B)  # pe-varying axis OUTER -> pe tile resident across batch

    seed_arr = jnp.array([seed], dtype=jnp.int32)
    kernel = functools.partial(
        _pos_enc_kernel,
        dropout_p=float(dropout_p),
        training=bool(training),
        rows_per_batch=rows,
    )

    itemsize = jnp.dtype(x.dtype).itemsize
    cost = pl.CostEstimate(
        flops=B * S * D,
        transcendentals=0,
        bytes_accessed=(2 * B * S * D + S * D) * itemsize,
    )

    out2 = pl.pallas_call(
        kernel,
        out_shape=jax.ShapeDtypeStruct((B, rows, cols), x.dtype),
        grid_spec=pltpu.PrefetchScalarGridSpec(
            num_scalar_prefetch=1,            # dropout seed (SMEM scalar)
            grid=grid,
            in_specs=[
                # batch dim squeezed; block = (TR, C)
                pl.BlockSpec((None, tr, cols), lambda r, b, sref: (b, r, 0)),
                # pe block index depends only on the OUTER grid axis -> fetched
                # once per row tile, resident across the inner batch loop.
                pl.BlockSpec((tr, cols), lambda r, b, sref: (r, 0)),
            ],
            out_specs=pl.BlockSpec((None, tr, cols), lambda r, b, sref: (b, r, 0)),
        ),
        compiler_params=pltpu.CompilerParams(
            dimension_semantics=("parallel", "parallel"),  # shard across TCs on v7x
        ),
        cost_estimate=cost,
    )(seed_arr, x2, pe2)

    return out2.reshape(B, S, D)


if __name__ == "__main__":
    B, S, D = 2, 8, 32          # batch=2, seq=8, d_model=32
    MAX_LEN = 64
    DROPOUT_P = 0.1

    key = jax.random.PRNGKey(0)
    x = jax.random.normal(key, (B, S, D), dtype=jnp.float32)
    pe_table = build_pe_table(D, MAX_LEN)
    ref = x + pe_table[:S][None, :, :]

    # Eval mode (dropout = identity): must match x + pe[:S] exactly.
    out_eval = positional_encoding(x, pe_table, dropout_p=DROPOUT_P, training=False)
    jax.block_until_ready(out_eval)
    assert jnp.allclose(out_eval, ref, atol=1e-6), "eval-mode mismatch vs reference"

    # Training mode (inverted dropout inside the kernel).
    out_train = positional_encoding(
        x, pe_table, dropout_p=DROPOUT_P, training=True, seed=1234
    )
    jax.block_until_ready(out_train)
    scale = 1.0 / (1.0 - DROPOUT_P)
    kept = jnp.isclose(out_train, ref * scale, atol=1e-5, rtol=1e-5)
    dropped = (out_train == 0.0)
    assert bool(jnp.all(kept | dropped)), "training-mode values are not {0, scaled}"
    assert bool(jnp.any(dropped)) and bool(jnp.any(kept)), "dropout mask degenerate"

    print("KERNEL_OK")
</pallas_src>

<mosaic_0001>
module attributes {stable_mosaic.version = 11 : i64} {
  func.func @_pos_enc_kernel(%arg0: i32, %arg1: i32, %arg2: memref<1xi32, #tpu.memory_space<smem>>, %arg3: memref<1x2x128xf32, #tpu.memory_space<vmem>>, %arg4: memref<2x128xf32, #tpu.memory_space<vmem>>, %arg5: memref<1x2x128xf32, #tpu.memory_space<vmem>>) attributes {dimension_semantics = [#tpu.dimension_semantics<parallel>, #tpu.dimension_semantics<parallel>], iteration_bounds = array<i64: 1, 2>, scalar_prefetch = 1 : i64, scratch_operands = 0 : i64, tpu.core_type = #tpu.core_type<tc>, window_params = [{transform_indices = @transform_0, window_bounds = array<i64: 1, 2, 128>}, {transform_indices = @transform_1, window_bounds = array<i64: 2, 128>}, {transform_indices = @transform_2, window_bounds = array<i64: 1, 2, 128>}]} {
    %c0 = arith.constant 0 : index
    %c0_0 = arith.constant 0 : index
    %c0_1 = arith.constant 0 : index
    %0 = vector.load %arg3[%c0, %c0_0, %c0_1] : memref<1x2x128xf32, #tpu.memory_space<vmem>>, vector<1x2x128xf32>
    %1 = vector.shape_cast %0 : vector<1x2x128xf32> to vector<2x128xf32>
    %c0_2 = arith.constant 0 : index
    %c0_3 = arith.constant 0 : index
    %2 = vector.load %arg4[%c0_2, %c0_3] : memref<2x128xf32, #tpu.memory_space<vmem>>, vector<2x128xf32>
    %3 = arith.addf %1, %2 : vector<2x128xf32>
    %c0_4 = arith.constant 0 : index
    %c0_5 = arith.constant 0 : index
    %c0_6 = arith.constant 0 : index
    %4 = vector.load %arg5[%c0_4, %c0_5, %c0_6] : memref<1x2x128xf32, #tpu.memory_space<vmem>>, vector<1x2x128xf32>
    %5 = vector.shape_cast %4 : vector<1x2x128xf32> to vector<2x128xf32>
    %6 = vector.shape_cast %3 : vector<2x128xf32> to vector<1x2x128xf32>
    tpu.vector_store %arg5[%c0_4, %c0_5, %c0_6], %6 {strides = array<i32>} : memref<1x2x128xf32, #tpu.memory_space<vmem>>, vector<1x2x128xf32>,
    return
  }
  func.func @transform_0(%arg0: i32, %arg1: i32, %arg2: memref<1xi32, #tpu.memory_space<smem>>) -> (i32, i32, i32) {
    %c0_i32 = arith.constant 0 : i32
    %c0_i32_0 = arith.constant 0 : i32
    return %arg1, %arg0, %c0_i32 : i32, i32, i32
  }
  func.func @transform_1(%arg0: i32, %arg1: i32, %arg2: memref<1xi32, #tpu.memory_space<smem>>) -> (i32, i32) {
    %c0_i32 = arith.constant 0 : i32
    %c0_i32_0 = arith.constant 0 : i32
    return %arg0, %c0_i32 : i32, i32
  }
  func.func @transform_2(%arg0: i32, %arg1: i32, %arg2: memref<1xi32, #tpu.memory_space<smem>>) -> (i32, i32, i32) {
    %c0_i32 = arith.constant 0 : i32
    %c0_i32_0 = arith.constant 0 : i32
    return %arg1, %arg0, %c0_i32 : i32, i32, i32
  }
}

</mosaic_0001>

<bundles_post_ra>
// kernel: tpu_custom_call.1
= control target key start
LH: loop header
LB: loop body
LE: loop exit
PB: predicated region body
PF: predicated region fallthrough
CT: control target
= control target key end

     0   :  { %9 = vsyncpa [#allocation5], 0  ;;  %s646_s0 = inlined_call_operand.<no memory space> [shape: s32[1], index: 0, kind: input, shape index: {}]   ;;  %s647_s1 = inlined_call_operand.hbm [shape: f32[2,2,128], index: 1, kind: input, shape index: {}]   ;;  %s648_s2 = inlined_call_operand.vmem [shape: f32[2,128], index: 2, kind: input, shape index: {}]   ;;  %s649_s3 = inlined_call_operand.hbm [shape: f32[2,2,128], index: 3, kind: output, shape index: {}]  }
   0x1   :  { %11 = vsyncpa [#allocation5 + $0x1], 0 }
   0x2   :  { %12 = vsyncpa [#allocation6], 0 }
   0x3   :  { %14 = vsyncpa [#allocation6 + $0x1], 0  ;;  %s523_s12 = smov 0   ;;  %s525_s13 = smov 0  }
   0x4   :  { %s527_s14 = smov 0   ;;  %s529_s0 = smov 0  }
   0x5   :  { %s531_s15 = smov 0   ;;  %s533_s16 = smov 0  }
   0x6 LB: > { %s313_s17 = sadd.s32 4294967295, %s501_s16   ;;  %s314_s18 = sadd.s32 4294967294, %s501_s16   ;;  %s501_s16 = sphi %s533_s16, %s20_s16   ;;  %s497_s15 = sphi %s531_s15, %s658_s15   ;;  %s493_s0 = sphi %s529_s0, %s657_s0   ;;  %s489_s14 = sphi %s527_s14, %s656_s14   ;;  %s485_s13 = sphi %s525_s13, %s655_s13   ;;  %s481_s12 = sphi %s523_s12, %s654_s12  }
   0x7   : > { %s29_s19 = sadd.s32 1, %s497_s15  ;;  %s41_s20 = sadd.s32 1, %s489_s14 }
   0x8   : > { %p30_p0 = scmp.ge.s32.totalorder %s29_s19, 2  ;;  %p48_p1 = scmp.ne.s32.totalorder %s489_s14, %s485_s13 }
   0x9   : > { %p49_p2 = scmp.eq.s32.totalorder %s501_s16, 0  ;;  %p54_p3 = scmp.ne.s32.totalorder %s485_s13, %s481_s12 }
   0xa   : > { %s660_s19 = smov (%p30_p0, %s29_s19), 0  ;;  %p55_p5 = scmp.eq.s32.totalorder %s313_s17, 0 }
   0xb   : > { %p564_p4 = por %p49_p2, %p48_p1  ;;  %s36_s22 = ssub.s32 %s497_s15, %s660_s19 }
   0xc   : > { %p106_p6 = scmp.eq.s32.totalorder %s313_s17, 1  ;;  %p39_p7 = scmp.eq.s32.totalorder %s36_s22, 0 }
   0xd   : > { %p570_p8 = por %p55_p5, %p54_p3  ;;  %p112_p10 = scmp.eq.s32.totalorder %s314_s18, 1 }
   0xe   : > { %p574_p9 = por %p106_p6, %p48_p1  ;;  %p317_p12 = scmp.ge.s32.totalorder %s501_s16, 2 }
   0xf   : > { %s579_s25 = scalar_select %p39_p7, %s489_s14, %s41_s20  }
  0x10   : > { %p581_p11 = por %p112_p10, %p54_p3  ;;  %p339_p13 = scmp.lt.s32.totalorder %s501_s16, 2 }
  0x11   : > { %s139_s27 = sand.u32 1, %s489_s14   ;;  %s319_s29 = sshll.u32 %s497_s15, 1 }
  0x12   : > { %s318_s28 = sshll.u32 %s139_s27, 1  ;;  %s148_s5 = scalar_lea.hbm %s647_s1, %s319_s29 }
  0x13   : > { %s143_s6 = scalar_lea.vmem [#allocation4], %s318_s28  ;;  %s150_s8 = sshll.u32 %s148_s5, 4  ;;  %s151_s8 = int_to_ptr.hbm [resolvable:$true] %s150_s8 }
  0x14   : > { %s152_s7 = sshll.u32 %s143_s6, 4  ;;  %p332_p0 = pnand %p339_p13, %p564_p4  ;;  %s153_s7 = int_to_ptr.vmem [resolvable:$true] %s152_s7 }
  0x15   : > { %p320_p1 = scmp.ge.s32.totalorder %s501_s16, 1  ;;  %p157_p2 = scmp.lt.s32.totalorder %s501_s16, 3 }
  0x16   : > { %s140_s9 = scalar_lea.sflag [#allocation5], %s139_s27 }
  0x17   : > { %334 = dma.hbm_to_vmem [thread:$0]  (!%p332_p0), %s151_s8, 32, %s153_s7, %s140_s9  }
  0x18   : > { %p158_p3 = pnand %p320_p1, %p157_p2 }
  0x19   : > { %s597_s10 = sand.u32 (!%p158_p3), 1, %s485_s13  }
  0x1a   : > { %161 = sbr.rel (%p158_p3) target bundleno = 47 (0x2f), region = 28  ;;  %s321_s11 = sshll.u32 (!%p158_p3), %s597_s10, 1 }
  0x1b   : > { %s164_s17 = scalar_lea.sflag (!%p158_p3), [#allocation5], %s597_s10  ;;  %s167_s18 = scalar_lea.vmem (!%p158_p3), [#allocation4], %s321_s11 }
  0x1f   : > { %472 = dma.done.wait (%p570_p8), %s164_s17, 32  }
  0x20   : > { %474 = vsyncadd (%p570_p8), %s164_s17, 4294967264  ;;  %s324_s20 = sshll.u32 %s493_s0, 1  ;;  %s192_s28 = scalar_lea.vmem [#allocation7], %s321_s11  ;;  %v197_v0 = vld [vmem:[%s167_s18] sm:$0x3] }
  0x21   : > { %s213_s27 = scalar_lea.hbm %s649_s3, %s324_s20  ;;  %s215_s29 = sshll.u32 %s192_s28, 4  ;;  %v198_v1 = vld [vmem:[%s648_s2] sm:$0x3]  ;;  %s216_s29 = int_to_ptr.vmem [resolvable:$true] %s215_s29 }
  0x22   : > { %s217_s30 = sshll.u32 %s213_s27, 4  ;;  %v199_v2 = vadd.f32 %v198_v1, %v197_v0  ;;  %s202_s23 = scalar_lea.sflag [#allocation6], %s597_s10  ;;  %s218_s30 = int_to_ptr.hbm [resolvable:$true] %s217_s30 }
  0x23   : > { %s433_s6 = sshra.s32 %s218_s30, 4  ;;  %s439_s9 = scalar_lea.hbm %s649_s3, 4  ;;  %s434_s6 = int_to_ptr.hbm [resolvable:$true] %s433_s6 }
  0x24   : > { %200 = vst [vmem:[%s192_s28] sm:$0x3] %v199_v2  ;;  %s435_s0 = scalar_lea.hbm %s434_s6, 2  ;;  %p440_p7 = scmp.lt.s32.totalorder %s434_s6, %s649_s3 }
  0x25   : > { %p436_p4 = scmp.ne.s32.totalorder %s434_s6, %s435_s0  ;;  %p441_p8 = scmp.lt.s32.totalorder %s439_s9, %s435_s0 }
  0x27   : > { %p437_p5 = pnand %p436_p4, %p574_p9  ;;  %p442_p10 = por %p441_p8, %p440_p7 }
  0x29   : > { %p438_p6 = pneg %p437_p5 }
  0x2b   : > { %p443_p13 = pnand %p442_p10, %p438_p6 }
  0x2d   : > { %446 = shalt.err (!%p443_p13)
}
  0x2e   : > { %329 = dma.vmem_to_hbm [thread:$0]  (%p574_p9), %s216_s29, 32, %s218_s30, %s202_s23  }
  0x2f PF: > { %s229_s10 = sand.u32 1, %s481_s12   ;;  %p336_p0 = pnand %p317_p12, %p581_p11 }
  0x30   : > { %s230_s18 = scalar_lea.sflag [#allocation6], %s229_s10 }
  0x31   : > { %p337_p1 = pneg %p336_p0 }
  0x33   : > { %476 = dma.done.wait (%p337_p1), %s230_s18, 32  }
  0x34   : > { %478 = vsyncadd (%p337_p1), %s230_s18, 4294967264  ;;  %s20_s16 = sadd.s32 1, %s501_s16   ;;  %s654_s12 = smov %s485_s13 }
  0x35   : > { %p17_p2 = scmp.ge.s32.totalorder %s20_s16, 4   ;;  %s655_s13 = smov %s489_s14 }
  0x36   : > { %s656_s14 = smov %s579_s25  ;;  %s657_s0 = smov %s497_s15 }
  0x37   : > { %s658_s15 = smov %s660_s19  ;;  %19 = sbr.rel (!%p17_p2) target bundleno = 6 (0x6), region = 76 }
  0x3c   :  { %236 = vsyncpa [#allocation5], 1 }
  0x3d   :  { %238 = vsyncpa [#allocation5 + $0x1], 1 }
  0x3e   :  { %239 = vsyncpa [#allocation6], 1 }
  0x3f   :  { %241 = vsyncpa [#allocation6 + $0x1], 1 }

</bundles_post_ra>
